<compile_context>
chip_gen: v7x
topology: tpu7x:2x2x1
jax: 0.10.0
libtpu: 0.0.40
codegen_flags: <defaults>
</compile_context>

<pallas_src>
import jax
import jax.numpy as jnp
from jax.experimental import pallas as pl
from jax.experimental.pallas import tpu as pltpu

IN_FEATURES = 784
OUT_FEATURES = 10

# Per-generation (max rows per batch tile, vmem_limit_bytes override).
_GEN_TILE_CONFIG = {
    "v5e": (1024, None),        # stay under the 16 MiB scoped VMEM default
    "v6e": (4096, 64 << 20),    # 128 MiB physical VMEM; raise the 32 MiB default
    "v7x": (4096, 48 << 20),    # 64 MiB physical VMEM; leave headroom
}
_DEFAULT_TILE_CONFIG = (1024, None)  # safe everywhere (incl. interpret/unknown)


def _tpu_generation():
    try:
        kind = jax.devices()[0].device_kind.lower()
    except Exception:
        return None
    if "v5 lite" in kind or "v5e" in kind or "v5lite" in kind:
        return "v5e"
    if "v6" in kind:
        return "v6e"
    if "v7" in kind:
        return "v7x"
    return None


def _round_up_8(n):
    return ((n + 7) // 8) * 8


def _linear_softmax_kernel(x_ref, w_ref, b_ref, o_ref):
    # Hot path: bf16 matmul on the MXU (f32 accumulate) + bias + numerically
    # stable softmax over the last axis, all in f32.
    x = x_ref[...]                      # (TILE_B, 784) bf16
    w = w_ref[...]                      # (784, 10)     bf16
    b = b_ref[...]                      # (1, 10)       f32
    logits = jnp.dot(x, w, preferred_element_type=jnp.float32) + b  # (TILE_B, 10) f32
    m = jnp.max(logits, axis=-1, keepdims=True)
    e = jnp.exp(logits - m)
    denom = jnp.sum(e, axis=-1, keepdims=True)
    # Exact divide: approx reciprocal (~1e-4 rel. error) broke the 1e-5 checks
    # and the kernel has plenty of VALU/EUP slack anyway.
    o_ref[...] = (e / denom).astype(o_ref.dtype)


def classificador_linear(x, w_t, b):
    """x: (B, 784) f32, w_t: (784, 10) f32, b: (1, 10) f32 -> (B, 10) f32."""
    B = x.shape[0]
    gen = _tpu_generation()
    max_tile_b, vmem_limit = _GEN_TILE_CONFIG.get(gen, _DEFAULT_TILE_CONFIG)

    # Tile the batch: multiple of 8 (sublane), capped per generation.
    tile_b = min(max_tile_b, _round_up_8(B))
    if gen == "v7x" and B >= 4 * 512:
        # Keep >= 4 grid steps so the two TensorCores load-balance.
        tile_b = min(tile_b, _round_up_8((B + 3) // 4))
    grid = (pl.cdiv(B, tile_b),)

    # Cast the bandwidth-dominant operands to bf16 at the call boundary.
    x_bf = x.astype(jnp.bfloat16)
    w_bf = w_t.astype(jnp.bfloat16)

    if gen == "v7x":
        dim_sem = (pltpu.CORE_PARALLEL,)   # make the megacore split real
    else:
        dim_sem = ("parallel",)

    cost = pl.CostEstimate(
        flops=2 * B * IN_FEATURES * OUT_FEATURES,
        bytes_accessed=(B * IN_FEATURES * 2            # x (bf16)
                        + IN_FEATURES * OUT_FEATURES * 2  # W (bf16)
                        + OUT_FEATURES * 4                # bias (f32)
                        + B * OUT_FEATURES * 4),          # out (f32)
        transcendentals=B * OUT_FEATURES,
    )

    return pl.pallas_call(
        _linear_softmax_kernel,
        out_shape=jax.ShapeDtypeStruct((B, OUT_FEATURES), jnp.float32),
        grid=grid,
        in_specs=[
            # x: one batch tile per grid step (double-buffered by Pallas).
            pl.BlockSpec((tile_b, IN_FEATURES), lambda i: (i, 0)),
            # weight/bias: same block every step -> VMEM-resident.
            pl.BlockSpec((IN_FEATURES, OUT_FEATURES), lambda i: (0, 0)),
            pl.BlockSpec((1, OUT_FEATURES), lambda i: (0, 0)),
        ],
        out_specs=pl.BlockSpec((tile_b, OUT_FEATURES), lambda i: (i, 0)),
        compiler_params=pltpu.CompilerParams(
            dimension_semantics=dim_sem,
            vmem_limit_bytes=vmem_limit,
        ),
        cost_estimate=cost,
    )(x_bf, w_bf, b)


def init_params(key):
    # Deterministic init mimicking torch.nn.Linear defaults:
    # weight, bias ~ U(-1/sqrt(in), 1/sqrt(in)).
    kw, kb = jax.random.split(key)
    bound = 1.0 / jnp.sqrt(jnp.float32(IN_FEATURES))
    # torch stores weight as (out, in); we keep the transposed (in, out) layout.
    w_t = jax.random.uniform(kw, (IN_FEATURES, OUT_FEATURES),
                             minval=-bound, maxval=bound, dtype=jnp.float32)
    b = jax.random.uniform(kb, (1, OUT_FEATURES),
                           minval=-bound, maxval=bound, dtype=jnp.float32)
    return w_t, b


if __name__ == "__main__":
    key = jax.random.PRNGKey(0)
    k_x, k_p = jax.random.split(key)

    B = 8
    x = jax.random.normal(k_x, (B, IN_FEATURES), dtype=jnp.float32)
    w_t, b = init_params(k_p)

    out = jax.block_until_ready(classificador_linear(x, w_t, b))

    # Reference uses the same bf16-rounded inputs with f32 accumulation,
    # matching what the MXU computes.
    def reference(xx):
        xb = xx.astype(jnp.bfloat16).astype(jnp.float32)
        wb = w_t.astype(jnp.bfloat16).astype(jnp.float32)
        return jax.nn.softmax(xb @ wb + b, axis=1)

    ref = reference(x)
    assert out.shape == (B, OUT_FEATURES)
    assert jnp.allclose(jnp.sum(out, axis=1), 1.0, atol=1e-5)
    assert jnp.allclose(out, ref, atol=2e-3)

    # Also exercise a batch that is not a multiple of the tile / of 8.
    B2 = 2053
    x2 = jax.random.normal(k_x, (B2, IN_FEATURES), dtype=jnp.float32)
    out2 = jax.block_until_ready(classificador_linear(x2, w_t, b))
    ref2 = reference(x2)
    assert jnp.allclose(jnp.sum(out2, axis=1), 1.0, atol=1e-5)
    assert jnp.allclose(out2, ref2, atol=2e-3)

    print("KERNEL_OK")
</pallas_src>

<mosaic_0001>
module attributes {stable_mosaic.version = 11 : i64} {
  func.func @_linear_softmax_kernel(%arg0: i32, %arg1: memref<8x784xbf16, #tpu.memory_space<vmem>>, %arg2: memref<784x10xbf16, #tpu.memory_space<vmem>>, %arg3: memref<1x10xf32, #tpu.memory_space<vmem>>, %arg4: memref<8x10xf32, #tpu.memory_space<vmem>>) attributes {dimension_semantics = [#tpu.dimension_semantics<parallel>], iteration_bounds = array<i64: 1>, scalar_prefetch = 0 : i64, scratch_operands = 0 : i64, tpu.core_type = #tpu.core_type<tc>, window_params = [{transform_indices = @transform_0, window_bounds = array<i64: 8, 784>}, {pipeline_mode = #tpu.pipeline_mode<synchronous>, transform_indices = @transform_1, window_bounds = array<i64: 784, 10>}, {pipeline_mode = #tpu.pipeline_mode<synchronous>, transform_indices = @transform_2, window_bounds = array<i64: 1, 10>}, {transform_indices = @transform_3, window_bounds = array<i64: 8, 10>}]} {
    %c0 = arith.constant 0 : index
    %c0_0 = arith.constant 0 : index
    %0 = vector.load %arg1[%c0, %c0_0] : memref<8x784xbf16, #tpu.memory_space<vmem>>, vector<8x784xbf16>
    %c0_1 = arith.constant 0 : index
    %c0_2 = arith.constant 0 : index
    %1 = vector.load %arg2[%c0_1, %c0_2] : memref<784x10xbf16, #tpu.memory_space<vmem>>, vector<784x10xbf16>
    %c0_3 = arith.constant 0 : index
    %c0_4 = arith.constant 0 : index
    %2 = vector.load %arg3[%c0_3, %c0_4] : memref<1x10xf32, #tpu.memory_space<vmem>>, vector<1x10xf32>
    %cst = arith.constant dense<0.000000e+00> : vector<8x10xf32>
    %3 = tpu.matmul %0, %1, %cst {dimension_numbers = #tpu.dot_dimension_numbers<[1], [0], [0], [1], [0, 0, 1, 1], [], []>} : vector<8x784xbf16>, vector<784x10xbf16>, vector<8x10xf32> -> vector<8x10xf32>
    %4 = vector.broadcast %2 : vector<1x10xf32> to vector<8x10xf32>
    %5 = arith.addf %3, %4 : vector<8x10xf32>
    %cst_5 = arith.constant dense<0xFF800000> : vector<8xf32>
    %6 = vector.multi_reduction <maximumf>, %5, %cst_5 [1] : vector<8x10xf32> to vector<8xf32>
    %7 = vector.shape_cast %6 : vector<8xf32> to vector<8x1xf32>
    %8 = vector.broadcast %7 : vector<8x1xf32> to vector<8x10xf32>
    %9 = arith.subf %5, %8 : vector<8x10xf32>
    %10 = math.exp %9 : vector<8x10xf32>
    %cst_6 = arith.constant dense<0.000000e+00> : vector<8xf32>
    %11 = vector.multi_reduction <add>, %10, %cst_6 [1] : vector<8x10xf32> to vector<8xf32>
    %12 = vector.shape_cast %11 : vector<8xf32> to vector<8x1xf32>
    %13 = vector.broadcast %12 : vector<8x1xf32> to vector<8x10xf32>
    %14 = arith.divf %10, %13 : vector<8x10xf32>
    %c0_7 = arith.constant 0 : index
    %c0_8 = arith.constant 0 : index
    %15 = vector.load %arg4[%c0_7, %c0_8] : memref<8x10xf32, #tpu.memory_space<vmem>>, vector<8x10xf32>
    tpu.vector_store %arg4[%c0_7, %c0_8], %14 {strides = array<i32>} : memref<8x10xf32, #tpu.memory_space<vmem>>, vector<8x10xf32>,
    return
  }
  func.func @transform_0(%arg0: i32) -> (i32, i32) {
    %c0_i32 = arith.constant 0 : i32
    %c0_i32_0 = arith.constant 0 : i32
    return %arg0, %c0_i32 : i32, i32
  }
  func.func @transform_1(%arg0: i32) -> (i32, i32) {
    %c0_i32 = arith.constant 0 : i32
    %c0_i32_0 = arith.constant 0 : i32
    %c0_i32_1 = arith.constant 0 : i32
    return %c0_i32, %c0_i32_0 : i32, i32
  }
  func.func @transform_2(%arg0: i32) -> (i32, i32) {
    %c0_i32 = arith.constant 0 : i32
    %c0_i32_0 = arith.constant 0 : i32
    %c0_i32_1 = arith.constant 0 : i32
    return %c0_i32, %c0_i32_0 : i32, i32
  }
  func.func @transform_3(%arg0: i32) -> (i32, i32) {
    %c0_i32 = arith.constant 0 : i32
    %c0_i32_0 = arith.constant 0 : i32
    return %arg0, %c0_i32 : i32, i32
  }
}

</mosaic_0001>

<bundles_post_ra>
// kernel: tpu_custom_call.1
= control target key start
LH: loop header
LB: loop body
LE: loop exit
PB: predicated region body
PF: predicated region fallthrough
CT: control target
= control target key end

     0   :  { %v853_v43 = vmov 0.0   ;;  %vm854_vm0 = vmmov 0   ;;  %s1053_s0 = inlined_call_operand.vmem [shape: bf16[8,784], index: 0, kind: input, shape index: {}]   ;;  %s1054_s1 = inlined_call_operand.vmem [shape: bf16[784,10], index: 1, kind: input, shape index: {}]   ;;  %s1055_s2 = inlined_call_operand.vmem [shape: f32[1,10], index: 2, kind: input, shape index: {}]   ;;  %s1056_s3 = inlined_call_operand.hbm [shape: f32[8,10], index: 3, kind: output, shape index: {}]  }
   0x1   :  { %v769_v0 = vld [vmem:[%s1054_s1 + $0x40] sm:$0xff]   ;;  %v773_v4 = vld [vmem:[%s1054_s1 + $0x48] sm:$0xff]   ;;  %v777_v8 = vld [vmem:[%s1054_s1 + $0x50] sm:$0xff]  }
   0x2   :  { %v770_v1 = vld [vmem:[%s1054_s1] sm:$0xff]   ;;  %692 = vmatprep.subr.bf16.mxu0 %v769_v0  ;;  %v774_v5 = vld [vmem:[%s1054_s1 + $0x8] sm:$0xff]   ;;  %v778_v9 = vld [vmem:[%s1054_s1 + $0x10] sm:$0xff]  }
   0x3   :  { %v771_v2 = vld [vmem:[%s1054_s1 + $0xc0] sm:$0xff]   ;;  %693 = vmatpush3.bf16.msra.mxu0 %v770_v1  ;;  %v775_v6 = vld [vmem:[%s1054_s1 + $0xc8] sm:$0xff]   ;;  %v779_v10 = vld [vmem:[%s1054_s1 + $0xd0] sm:$0xff]  }
   0x4   :  { %v772_v3 = vld [vmem:[%s1054_s1 + $0x80] sm:$0xff]   ;;  %714 = vmatprep.subr.bf16.mxu1 %v771_v2  ;;  %694 = vmatprep.subr.bf16.mxu0 %v773_v4  ;;  %v776_v7 = vld [vmem:[%s1054_s1 + $0x88] sm:$0xff]   ;;  %v780_v11 = vld [vmem:[%s1054_s1 + $0x90] sm:$0xff]  }
   0x5   :  { %715 = vmatpush3.bf16.msra.mxu1 %v772_v3  ;;  %v781_v12 = vld [vmem:[%s1054_s1 + $0x58] sm:$0xff]   ;;  %v785_v16 = vld [vmem:[%s1054_s1 + $0x60] sm:$0xff]   ;;  %v789_v20 = vld [vmem:[%s1054_s1 + $0x68] sm:$0xff]  }
   0x6   :  { %716 = vmatprep.subr.bf16.mxu1 %v775_v6  ;;  %v782_v13 = vld [vmem:[%s1054_s1 + $0x18] sm:$0xff]   ;;  %v786_v17 = vld [vmem:[%s1054_s1 + $0x20] sm:$0xff]   ;;  %v790_v21 = vld [vmem:[%s1054_s1 + $0x28] sm:$0xff]  }
   0x7   :  { %695 = vmatpush3.bf16.msra.mxu0 %v774_v5  ;;  %v783_v14 = vld [vmem:[%s1054_s1 + $0xd8] sm:$0xff]   ;;  %v787_v18 = vld [vmem:[%s1054_s1 + $0xe0] sm:$0xff]   ;;  %v791_v22 = vld [vmem:[%s1054_s1 + $0xe8] sm:$0xff]  }
   0x8   :  { %696 = vmatprep.subr.bf16.mxu0 %v777_v8  ;;  %v784_v15 = vld [vmem:[%s1054_s1 + $0x98] sm:$0xff]   ;;  %v788_v19 = vld [vmem:[%s1054_s1 + $0xa0] sm:$0xff]   ;;  %v792_v23 = vld [vmem:[%s1054_s1 + $0xa8] sm:$0xff]  }
   0x9   :  { %717 = vmatpush3.bf16.msra.mxu1 %v776_v7  ;;  %v793_v24 = vld [vmem:[%s1054_s1 + $0x70] sm:$0xff]   ;;  %v797_v28 = vld [vmem:[%s1054_s1 + $0x78] sm:$0xff]   ;;  %v16_v31 = vld [vmem:[%s1053_s0] sm:$0xff] }
   0xa   :  { %718 = vmatprep.subr.bf16.mxu1 %v779_v10  ;;  %v794_v25 = vld [vmem:[%s1054_s1 + $0x30] sm:$0xff]   ;;  %v798_v29 = vld [vmem:[%s1054_s1 + $0x38] sm:$0xff]   ;;  %v635_v32 = vcombine.low %v16_v31, %v16_v31  ;;  %v636_v33 = vcombine.high %v16_v31, %v16_v31  ;;  %v803_v35 = vld [vmem:[%s1054_s1 + $0x140] sm:$0xff]  }
   0xb   :  { %697 = vmatpush3.bf16.msra.mxu0 %v778_v9  ;;  %v795_v26 = vld [vmem:[%s1054_s1 + $0xf0] sm:$0xff]   ;;  %v799_v30 = vld [vmem:[%s1054_s1 + $0xf8] sm:$0xff]   ;;  %v17_v36 = vld [vmem:[%s1053_s0 + $0x8] sm:$0xff] }
   0xc   :  { %698 = vmatprep.subr.bf16.mxu0 %v781_v12  ;;  %v796_v27 = vld [vmem:[%s1054_s1 + $0xb0] sm:$0xff]   ;;  %v802_v34 = vld [vmem:[%s1054_s1 + $0xb8] sm:$0xff]   ;;  %479 = vmatprep.mubr.bf16.mxu0 %v636_v33  ;;  %v637_v37 = vcombine.low %v17_v36, %v17_v36  ;;  %v638_v38 = vcombine.high %v17_v36, %v17_v36  ;;  %v806_v39 = vld [vmem:[%s1054_s1 + $0x100] sm:$0xff]  }
   0xd   :  { %719 = vmatpush3.bf16.msra.mxu1 %v780_v11  ;;  %v807_v40 = vld [vmem:[%s1054_s1 + $0x148] sm:$0xff]   ;;  %v809_v42 = vld [vmem:[%s1054_s1 + $0x150] sm:$0xff]   ;;  %v811_v45 = vld [vmem:[%s1054_s1 + $0x158] sm:$0xff]  }
   0xe   :  { %720 = vmatprep.subr.bf16.mxu1 %v783_v14  ;;  %519 = vmatprep.mubr.bf16.mxu1 %v638_v38  ;;  %v808_v41 = vld [vmem:[%s1054_s1 + $0x108] sm:$0xff]   ;;  %v810_v44 = vld [vmem:[%s1054_s1 + $0x110] sm:$0xff]   ;;  %v812_v46 = vld [vmem:[%s1054_s1 + $0x118] sm:$0xff]  }
   0xf   :  { %699 = vmatpush3.bf16.msra.mxu0 %v782_v13  ;;  %v813_v47 = vld [vmem:[%s1054_s1 + $0x160] sm:$0xff]   ;;  %v815_v49 = vld [vmem:[%s1054_s1 + $0x168] sm:$0xff]   ;;  %v18_v51 = vld [vmem:[%s1053_s0 + $0x10] sm:$0xff] }
  0x10   :  { %700 = vmatprep.subr.bf16.mxu0 %v785_v16  ;;  %v814_v48 = vld [vmem:[%s1054_s1 + $0x120] sm:$0xff]   ;;  %v640_v52 = vcombine.high %v18_v51, %v18_v51  ;;  %v824_v53 = vld [vmem:[%s1053_s0 + $0x18] ss:$0 sps:$4 sm:$0xff]  }
  0x11   :  { %721 = vmatpush3.bf16.msra.mxu1 %v784_v15  ;;  %v821_v50 = vld [vmem:[%s1054_s1 + $0x180] sm:$0xff]  }
  0x12   :  { %722 = vmatprep.subr.bf16.mxu1 %v787_v18 }
  0x13   :  { %701 = vmatpush3.bf16.msra.mxu0 %v786_v17 }
  0x14   :  { %702 = vmatprep.subr.bf16.mxu0 %v789_v20 }
  0x15   :  { %723 = vmatpush3.bf16.msra.mxu1 %v788_v19 }
  0x16   :  { %724 = vmatprep.subr.bf16.mxu1 %v791_v22 }
  0x17   :  { %703 = vmatpush3.bf16.msra.mxu0 %v790_v21 }
  0x18   :  { %704 = vmatprep.subr.bf16.mxu0 %v793_v24 }
  0x19   :  { %725 = vmatpush3.bf16.msra.mxu1 %v792_v23 }
  0x1a   :  { %726 = vmatprep.subr.bf16.mxu1 %v795_v26 }
  0x1b   :  { %705 = vmatpush3.bf16.msra.mxu0 %v794_v25 }
  0x1c   :  { %706 = vmatprep.subr.bf16.mxu0 %v797_v28 }
  0x1d   :  { %727 = vmatpush3.bf16.msra.mxu1 %v796_v27 }
  0x1e   :  { %728 = vmatprep.subr.bf16.mxu1 %v799_v30 }
  0x1f   :  { %707 = vmatpush3.bf16.msra.mxu0 %v798_v29 }
  0x20   :  { %736 = vmatprep.subr.bf16.mxu0 %v803_v35 }
  0x21   :  { %729 = vmatpush3.bf16.msra.mxu1 %v802_v34 }
  0x22   :  { %480 = vmatmul.mubr.bf16.vlgmr.msra.gmra.mrb[0].mxu0 %v635_v32  ;;  %760 = vmatprep.subr.bf16.mxu1 %v853_v43 }
  0x23   :  { %737 = vmatpush3.bf16.msra.mxu0 %v806_v39 }
  0x24   :  { %520 = vmatmul.mubr.bf16.vlgmr.msra.gmra.mrb[0].mxu1 %v637_v37  ;;  %738 = vmatprep.subr.bf16.mxu0 %v807_v40 }
  0x25   :  { %762 = vmatprep.mubr.msk.bf16.mxu1 %vm854_vm0, %v853_v43 }
  0x27   :  { %739 = vmatpush3.bf16.msra.mxu0 %v808_v41 }
  0x28   :  { %740 = vmatprep.subr.bf16.mxu0 %v809_v42 }
  0x2b   :  { %741 = vmatpush3.bf16.msra.mxu0 %v810_v44 }
  0x2c   :  { %742 = vmatprep.subr.bf16.mxu0 %v811_v45 }
  0x2f   :  { %743 = vmatpush3.bf16.msra.mxu0 %v812_v46 }
  0x30   :  { %744 = vmatprep.subr.bf16.mxu0 %v813_v47 }
  0x31   :  { %8 = vsyncpa [#allocation3], 0  ;;  %761 = vmatpush3.bf16.msra.mxu1 %v821_v50  ;;  %vm443_vm1 = vcmask 130048   ;;  %v816_v54 = vld [vmem:[%s1054_s1 + $0x128] sm:$0xff]   ;;  %559 = vmatprep.mubr.bf16.mxu0 %v640_v52  ;;  %v817_v55 = vld [vmem:[%s1054_s1 + $0x170] sm:$0xff]   ;;  %v639_v59 = vcombine.low %v18_v51, %v18_v51  ;;  %vm607_vm2 = vcmask 80896  }
  0x32   :  { %v818_v56 = vld [vmem:[%s1054_s1 + $0x130] sm:$0xff]   ;;  %v819_v57 = vld [vmem:[%s1054_s1 + $0x178] sm:$0xff]   ;;  %v634_v61 = vld [vmem:[%s1055_s2] ss:$0 sm:$0xff] }
  0x33   :  { %745 = vmatpush3.bf16.msra.mxu0 %v814_v48  ;;  %v820_v58 = vld [vmem:[%s1054_s1 + $0x138] sm:$0xff]   ;;  %s855_s1 = smov [#allocation2]  }
  0x34   :  { %746 = vmatprep.subr.bf16.mxu0 %v815_v49  ;;  %763 = vmatmul.mubr.msk.bf16.vlgmr.msra.gmra.mrb[4].mxu1 %vm443_vm1, %v824_v53  ;;  %s626_s2 = sshll.u32 %s855_s1, 4  ;;  %s627_s2 = int_to_ptr.vmem [resolvable:$true] %s626_s2 }
  0x35   :  { %s829_s11 = scalar_lea.vmem %s627_s2, 128  ;;  %p834_p1 = scmp.lt.s32.totalorder %s627_s2, %s627_s2 }
  0x36   :  { %p830_p0 = scmp.ne.s32.totalorder %s627_s2, %s829_s11  ;;  %p835_p2 = scmp.lt.s32.totalorder %s829_s11, %s829_s11 }
  0x37   :  { %747 = vmatpush3.bf16.msra.mxu0 %v816_v54 }
  0x38   :  { %748 = vmatprep.subr.bf16.mxu0 %v817_v55  ;;  %p836_p3 = por %p835_p2, %p834_p1 }
  0x3a   :  { %p837_p4 = pnand %p836_p3, %p830_p0 }
  0x3b   :  { %749 = vmatpush3.bf16.msra.mxu0 %v818_v56 }
  0x3c   :  { %750 = vmatprep.subr.bf16.mxu0 %v819_v57 }
  0x3f   :  { %751 = vmatpush3.bf16.msra.mxu0 %v820_v58 }
  0x42   :  { %560 = vmatmul.mubr.bf16.vlgmr.msra.gmra.mrb[4].mxu0 %v639_v59 }
  0xf5   :  { %v708_v60 = vpop.f32.mrb[0].mxu0 }
  0xf6   :  { %v709_v62 = vpop.f32.mrb[1].mxu0 }
  0xf7   :  { %v710_v63 = vadd.f32 %v709_v62, %v708_v60  ;;  %v711_v0 = vpop.f32.mrb[2].mxu0  ;;  %v730_v1 = vpop.f32.mrb[0].mxu1 }
  0xf8   :  { %v712_v2 = vpop.f32.mrb[3].mxu0  ;;  %v731_v3 = vpop.f32.mrb[1].mxu1 }
  0xf9   :  { %v482_v4 = vadd.f32 %v710_v63, %v634_v61  ;;  %v732_v5 = vadd.f32 %v731_v3, %v730_v1  ;;  %v733_v6 = vpop.f32.mrb[2].mxu1 }
  0xfa   :  { %v734_v7 = vpop.f32.mrb[3].mxu1 }
  0xfb   :  { %v522_v8 = vadd.f32 %v732_v5, %v482_v4 }
 0x107   :  { %v601_v9 = vpop.f32.mrb[4].mxu1 }
 0x108   :  { %v764_v10 = vpop.f32.mrb[5].mxu1 }
 0x109   :  { %v604_v11 = vpop.f32.mrb[6].mxu1 }
 0x10a   :  { %v765_v12 = vpop.f32.mrb[7].mxu1 }
 0x115   :  { %v752_v13 = vpop.f32.mrb[4].mxu0 }
 0x116   :  { %v753_v14 = vpop.f32.mrb[5].mxu0 }
 0x117   :  { %v754_v15 = vadd.f32 %v753_v14, %v752_v13  ;;  %v755_v16 = vpop.f32.mrb[6].mxu0 }
 0x118   :  { %v756_v17 = vpop.f32.mrb[7].mxu0 }
 0x119   :  { %v562_v18 = vadd.f32 %v754_v15, %v522_v8 }
 0x11b   :  { %v602_v19 = vadd.f32 %v601_v9, %v562_v18 }
 0x11d   :  { %v608_v20 = vsel %vm607_vm2, %v602_v19, -inf }
 0x11e   :  { %609 = vmax.xlane.f32.xlu0 %v608_v20 }
 0x1ab   :  { %v610_v21 = vpop.xlane.xlu0 %609 }
 0x1ac   :  { %v611_v22 = vsub.f32 %v602_v19, %v610_v21 }
 0x1ae   :  { %v612_v23 = vmul.f32 1.442695, %v611_v22 }
 0x1b0   :  { %825 = vpow2.f32 %v612_v23 }
 0x1ba   :  { %v826_v24 = vpop.eup %825 }
 0x1bb   :  { %v614_v25 = vsel %vm607_vm2, %v826_v24, 0.0 }
 0x1bc   :  { %615 = vadd.xlane.f32.xlu0 %v614_v25 }
 0x249   :  { %v616_v26 = vpop.xlane.xlu0 %615 }
 0x24a   :  { %827 = vrcp.f32 %v616_v26 }
 0x254   :  { %v828_v27 = vpop.eup %827 }
 0x255   :  { %v618_v28 = vmul.f32 %v828_v27, %v826_v24 }
 0x257   :  { %619 = vst.msk [vmem:[#allocation2] sm:$0xff] %vm607_vm2, %v618_v28 }
 0x258   :  { %840 = shalt.err (!%p837_p4)
}
 0x259   :  { %s841_s14 = scalar_lea.hbm %s1056_s3, 128 }
 0x25a   :  { %p842_p5 = scmp.ne.s32.totalorder %s1056_s3, %s841_s14  ;;  %p845_p6 = scmp.lt.u32.totalorder %s841_s14, %s1056_s3 }
 0x25c   :  { %p847_p7 = pnand %p845_p6, %p842_p5 }
 0x25e   :  { %850 = shalt.err (!%p847_p7)
}
 0x25f   :  { %629 = dma.vmem_to_hbm [thread:$0]  %s627_s2, 128, %s1056_s3, [#allocation3]  }
 0x260   :  { %851 = dma.done.wait [#allocation3], 128  }
 0x261   :  { %852 = vsyncadd [#allocation3], 4294967168 }
 0x262   :  { %633 = vsyncpa [#allocation3], 1 }

</bundles_post_ra>
